<compile_context>
chip_gen: v5e
topology: v5e:2x2
jax: 0.10.0
libtpu: 0.0.40
codegen_flags: <defaults>
</compile_context>

<pallas_src>
import functools

import jax
import jax.numpy as jnp
from jax.experimental import pallas as pl
from jax.experimental.pallas import tpu as pltpu


def _round_up(x, m):
    return ((x + m - 1) // m) * m


def _sep_kernel(frames_ref, w_proj_ref, w_dec_t_ref, out_ref, *,
                dim, c_sources, length_seg):
    D, C, L = dim, c_sources, length_seg

    frames = frames_ref[...]                             # (K, TN); row L is constant 1 (bias)
    tn = frames.shape[-1]

    # Single fused projection (one MXU stream): rows [0:D) -> encoder features,
    # rows [D:) -> mask logits (for C == 2: the pre-differenced logit l0 - l1).
    # Biases ride the constant-1 row of `frames`, so no broadcast adds.
    proj = jnp.dot(w_proj_ref[...], frames,
                   preferred_element_type=jnp.float32)    # (R, TN) f32

    feat = proj[:D, :]                                    # (D, TN)

    if C == 2:
        # softmax over 2 sources == sigmoid(l0 - l1); stable two-sided form with
        # EUP approximate reciprocal + one Newton step (denom in (1, 2]).
        diff = proj[D:2 * D, :]                           # (D, TN)
        e = jnp.exp(-jnp.abs(diff))
        denom = 1.0 + e
        inv = pl.reciprocal(denom, approx=True)
        inv = inv * (2.0 - denom * inv)
        m0 = jnp.where(diff >= 0, inv, 1.0 - inv)         # sigmoid(diff)
        masked0 = feat * m0
        # mask1 = 1 - mask0  =>  masked1 = feat - masked0 (saves a full multiply pass)
        masked = jnp.concatenate([masked0, feat - masked0], axis=1)        # (D, 2*TN)
    else:
        logits = proj[D:, :]                              # (C*D, TN)
        parts = [logits[i * D:(i + 1) * D, :] for i in range(C)]
        m = parts[0]
        for p in parts[1:]:
            m = jnp.maximum(m, p)
        exps = [jnp.exp(p - m) for p in parts]
        denom = exps[0]
        for ex in exps[1:]:
            denom = denom + ex
        inv = pl.reciprocal(denom, approx=True)
        inv = inv * (2.0 - denom * inv)                   # one Newton step (~f32)
        feat_inv = feat * inv                             # hoisted 1/denom multiply
        masked = jnp.concatenate([feat_inv * ex for ex in exps], axis=1)   # (D, C*TN)

    # One decoder matmul for all sources: single weight push, one long drain.
    dec = jnp.dot(w_dec_t_ref[...], masked.astype(w_dec_t_ref.dtype),
                  preferred_element_type=jnp.float32)     # (L, C*TN)
    for i in range(C):
        out_ref[i * L:(i + 1) * L, :] = dec[:, i * tn:(i + 1) * tn].astype(out_ref.dtype)


def baseline_separator(mixture, params, *, c_sources, length_seg, dim,
                       tile_n=2048, compute_dtype=jnp.float32,
                       out_dtype=jnp.float32):
    """Forward pass of BaselineModel; returns preds (B, c_sources, T_out).

    compute_dtype / out_dtype = bf16 are recommended on real v6e/v7x hardware
    (full-rate MXU + halved HBM traffic); the defaults stay f32 so the script
    also runs on backends without a bf16 dot path (CPU / interpret mode).
    """
    w_enc, b_enc, w_msk, b_msk, w_dec, b_dec = params
    B, T = mixture.shape
    L, D, C = length_seg, dim, c_sources
    assert L % 2 == 0, "length_seg must be even (stride = length_seg // 2)"
    hop = L // 2
    F = (T - L) // hop + 1
    N = B * F
    f32 = jnp.float32

    # ---- weight prep: encoder->mask fusion, bias folding, C==2 specialization ----
    w_enc_mat = w_enc[:, 0, :].astype(f32)                           # (D, L)
    w_msk_mat = w_msk[:, :, 0].astype(f32)                           # (C*D, D)
    w_dec_t = jnp.transpose(w_dec[:, 0, :], (1, 0)).astype(f32)      # (L, D)
    w_fused = w_msk_mat @ w_enc_mat                                  # (C*D, L)
    b_fused = w_msk_mat @ b_enc.astype(f32) + b_msk.astype(f32)      # (C*D,)
    if C == 2:
        w_mask_rows = w_fused[:D] - w_fused[D:]                      # (D, L)  logit diff
        b_mask_rows = b_fused[:D] - b_fused[D:]
    else:
        w_mask_rows = w_fused                                        # (C*D, L)
        b_mask_rows = b_fused
    # Fold biases into the contraction dim (constant-1 row appended to frames),
    # and zero-pad K to a multiple of 8 (free: K pads to 128/256 in the MXU anyway).
    k_dim = L + 1
    k_pad = _round_up(k_dim, 8)
    w_proj = jnp.concatenate([
        jnp.concatenate([w_enc_mat, b_enc.astype(f32)[:, None]], axis=1),
        jnp.concatenate([w_mask_rows, b_mask_rows[:, None]], axis=1),
    ], axis=0)                                                       # (R, L+1)
    w_proj = jnp.pad(w_proj, ((0, 0), (0, k_pad - k_dim)))           # (R, k_pad)
    R = w_proj.shape[0]

    # ---- gather-free unfold into overlapping frames (hop = L/2) + bias row ----
    # TODO(synk): build the overlapping windows inside the kernel (hop-blocked mixture
    # + shifted index maps / manual DMA) to avoid materializing the 2x frames in HBM.
    blocks = mixture[:, :(F + 1) * hop].reshape(B, F + 1, hop)
    lo = blocks[:, :F, :].reshape(N, hop)                            # frame first halves
    hi = blocks[:, 1:, :].reshape(N, hop)                            # frame second halves
    frames_t = jnp.concatenate([lo, hi], axis=1).T.astype(f32)       # (L, N)
    frames_t = jnp.concatenate(
        [frames_t, jnp.ones((1, N), f32), jnp.zeros((k_pad - k_dim, N), f32)],
        axis=0)                                                      # (k_pad, N)

    # ---- lane tiling: big tiles (amortize ~0.35us/step), >=2 tiles for v7x megacore ----
    n_ceil = _round_up(N, 128)
    tile_n = max(128, min(_round_up(tile_n, 128), n_ceil))
    if tile_n >= n_ceil and N >= 256:
        tile_n = _round_up((N + 1) // 2, 128)     # keep >=2 grid steps so "parallel"
        # can shard across both TensorCores on dual-core chips (v7x).
    n_pad = _round_up(N, tile_n)
    frames_t = jnp.pad(frames_t, ((0, 0), (0, n_pad - N))).astype(compute_dtype)

    kernel = functools.partial(_sep_kernel, dim=D, c_sources=C, length_seg=L)

    out = pl.pallas_call(
        kernel,
        out_shape=jax.ShapeDtypeStruct((C * L, n_pad), out_dtype),
        grid_spec=pltpu.PrefetchScalarGridSpec(
            num_scalar_prefetch=0,
            grid=(n_pad // tile_n,),
            in_specs=[
                pl.BlockSpec((k_pad, tile_n), lambda i: (0, i)),     # frames^T (+bias row)
                pl.BlockSpec((R, k_pad), lambda i: (0, 0)),          # fused projection weight
                pl.BlockSpec((L, D), lambda i: (0, 0)),              # W_dec^T
            ],
            out_specs=pl.BlockSpec((C * L, tile_n), lambda i: (0, i)),
        ),
        compiler_params=pltpu.CompilerParams(
            dimension_semantics=("parallel",),
            vmem_limit_bytes=32 * 1024 * 1024),
    )(frames_t, w_proj.astype(compute_dtype), w_dec_t.astype(compute_dtype))

    # ---- overlap-add (ConvTranspose1d with stride = hop) + decoder bias ----
    # Accumulate in the kernel's native (C, hop, B, F+1) order; only the final
    # T-sized result gets transposed (half the transposed volume of a contrib-first path).
    out_r = out[:, :N].astype(f32).reshape(C, L, B, F)
    ola = jnp.zeros((C, hop, B, F + 1), f32)
    ola = ola.at[:, :, :, :F].add(out_r[:, :hop])     # frame f -> [f*hop, (f+1)*hop)
    ola = ola.at[:, :, :, 1:].add(out_r[:, hop:])     # frame f -> [(f+1)*hop, (f+2)*hop)
    preds = jnp.transpose(ola, (2, 0, 3, 1)).reshape(B, C, (F + 1) * hop)
    return preds + b_dec[0]


def ref_forward(mixture, params, *, c_sources, length_seg, dim):
    """Pure-JAX reference with identical semantics to the PyTorch forward."""
    w_enc, b_enc, w_msk, b_msk, w_dec, b_dec = params
    B, T = mixture.shape
    L = length_seg
    hop = L // 2
    F = (T - L) // hop + 1
    idx = jnp.arange(F)[:, None] * hop + jnp.arange(L)[None, :]
    frames = mixture[:, idx].astype(jnp.float32)                            # (B, F, L)
    feat = jnp.einsum('bfl,dl->bfd', frames, w_enc[:, 0, :]) + b_enc        # (B, F, D)
    logits = jnp.einsum('bfd,ed->bfe', feat, w_msk[:, :, 0]) + b_msk        # (B, F, C*D)
    logits = logits.reshape(B, F, c_sources, dim)
    masks = jax.nn.softmax(logits, axis=2)                                  # softmax over sources
    masked = feat[:, :, None, :] * masks                                    # (B, F, C, D)
    contrib = jnp.einsum('bfcd,dl->bfcl', masked, w_dec[:, 0, :])           # (B, F, C, L)
    t_out = (F - 1) * hop + L
    preds = jnp.zeros((B, c_sources, t_out), jnp.float32)
    for f in range(F):                                                      # tiny test sizes only
        preds = preds.at[:, :, f * hop:f * hop + L].add(contrib[:, f])
    return preds + b_dec[0]


def init_params(key, *, c_sources, length_seg, dim):
    """Deterministic synthetic parameters (PyTorch-style uniform init ranges)."""
    L, D, C = length_seg, dim, c_sources
    k_enc, k_benc, k_msk, k_bmsk, k_dec, k_bdec = jax.random.split(key, 6)

    s_enc = 1.0 / jnp.sqrt(1.0 * L)          # Conv1d(1, D, L): fan_in = 1*L
    s_msk = 1.0 / jnp.sqrt(1.0 * D)          # Conv1d(D, C*D, 1): fan_in = D
    s_dec = 1.0 / jnp.sqrt(1.0 * D * L)      # ConvTranspose1d(D, 1, L)

    w_enc = jax.random.uniform(k_enc, (D, 1, L), jnp.float32, -s_enc, s_enc)
    b_enc = jax.random.uniform(k_benc, (D,), jnp.float32, -s_enc, s_enc)
    w_msk = jax.random.uniform(k_msk, (C * D, D, 1), jnp.float32, -s_msk, s_msk)
    b_msk = jax.random.uniform(k_bmsk, (C * D,), jnp.float32, -s_msk, s_msk)
    w_dec = jax.random.uniform(k_dec, (D, 1, L), jnp.float32, -s_dec, s_dec)
    b_dec = jax.random.uniform(k_bdec, (1,), jnp.float32, -s_dec, s_dec)
    return (w_enc, b_enc, w_msk, b_msk, w_dec, b_dec)


if __name__ == "__main__":
    key = jax.random.PRNGKey(0)

    def check(c_sources, length_seg, dim, B, T, tol):
        k_mix, k_par = jax.random.split(jax.random.fold_in(key, c_sources))
        mixture = jax.random.normal(k_mix, (B, T), jnp.float32)
        params = init_params(k_par, c_sources=c_sources,
                             length_seg=length_seg, dim=dim)
        expected = ref_forward(mixture, params, c_sources=c_sources,
                               length_seg=length_seg, dim=dim)
        run = jax.jit(functools.partial(
            baseline_separator, c_sources=c_sources,
            length_seg=length_seg, dim=dim))
        preds = jax.block_until_ready(run(mixture, params))
        assert preds.shape == expected.shape, (preds.shape, expected.shape)
        err = float(jnp.max(jnp.abs(preds - expected)))
        assert jnp.allclose(preds, expected, rtol=tol, atol=tol), \
            f"mismatch (C={c_sources}): max abs err {err}"

    C_SOURCES = 2
    LENGTH_SEG = 16
    DIM = 32          # small hidden size for the test (module default is 128)
    B, T = 2, 128     # T chosen so (T - L) % (L // 2) == 0

    # Default 2-source model: exercises the sigmoid-specialized mask path.
    check(c_sources=C_SOURCES, length_seg=LENGTH_SEG, dim=DIM, B=B, T=T, tol=1e-3)
    # 3-source model: exercises the general softmax path.
    check(c_sources=3, length_seg=LENGTH_SEG, dim=DIM, B=B, T=T, tol=1e-3)

    print("KERNEL_OK")
</pallas_src>

<mosaic_0001>
module attributes {stable_mosaic.version = 11 : i64} {
  func.func @_sep_kernel(%arg0: i32, %arg1: memref<24x128xf32, #tpu.memory_space<vmem>>, %arg2: memref<64x24xf32, #tpu.memory_space<vmem>>, %arg3: memref<16x32xf32, #tpu.memory_space<vmem>>, %arg4: memref<32x128xf32, #tpu.memory_space<vmem>>) attributes {dimension_semantics = [#tpu.dimension_semantics<parallel>], iteration_bounds = array<i64: 1>, scalar_prefetch = 0 : i64, scratch_operands = 0 : i64, tpu.core_type = #tpu.core_type<tc>, window_params = [{transform_indices = @transform_0, window_bounds = array<i64: 24, 128>}, {pipeline_mode = #tpu.pipeline_mode<synchronous>, transform_indices = @transform_1, window_bounds = array<i64: 64, 24>}, {pipeline_mode = #tpu.pipeline_mode<synchronous>, transform_indices = @transform_2, window_bounds = array<i64: 16, 32>}, {transform_indices = @transform_3, window_bounds = array<i64: 32, 128>}]} {
    %c0 = arith.constant 0 : index
    %c0_0 = arith.constant 0 : index
    %0 = vector.load %arg1[%c0, %c0_0] : memref<24x128xf32, #tpu.memory_space<vmem>>, vector<24x128xf32>
    %c0_1 = arith.constant 0 : index
    %c0_2 = arith.constant 0 : index
    %1 = vector.load %arg2[%c0_1, %c0_2] : memref<64x24xf32, #tpu.memory_space<vmem>>, vector<64x24xf32>
    %cst = arith.constant dense<0.000000e+00> : vector<64x128xf32>
    %2 = tpu.matmul %1, %0, %cst {dimension_numbers = #tpu.dot_dimension_numbers<[1], [0], [0], [1], [0, 0, 1, 1], [], []>} : vector<64x24xf32>, vector<24x128xf32>, vector<64x128xf32> -> vector<64x128xf32>
    %3 = vector.extract_strided_slice %2 {offsets = [0, 0], sizes = [32, 128], strides = [1, 1]} : vector<64x128xf32> to vector<32x128xf32>
    %4 = vector.extract_strided_slice %2 {offsets = [32, 0], sizes = [32, 128], strides = [1, 1]} : vector<64x128xf32> to vector<32x128xf32>
    %5 = math.absf %4 : vector<32x128xf32>
    %cst_3 = arith.constant 0.000000e+00 : f32
    %6 = vector.broadcast %cst_3 : f32 to vector<32x128xf32>
    %7 = arith.subf %6, %5 : vector<32x128xf32>
    %8 = math.exp %7 : vector<32x128xf32>
    %cst_4 = arith.constant 1.000000e+00 : f32
    %9 = vector.broadcast %cst_4 : f32 to vector<32x128xf32>
    %10 = arith.addf %9, %8 : vector<32x128xf32>
    %11 = tpu.reciprocal %10 {approx = true} : vector<32x128xf32> -> vector<32x128xf32>
    %12 = arith.mulf %10, %11 : vector<32x128xf32>
    %cst_5 = arith.constant 2.000000e+00 : f32
    %13 = vector.broadcast %cst_5 : f32 to vector<32x128xf32>
    %14 = arith.subf %13, %12 : vector<32x128xf32>
    %15 = arith.mulf %11, %14 : vector<32x128xf32>
    %cst_6 = arith.constant 0.000000e+00 : f32
    %16 = vector.broadcast %cst_6 : f32 to vector<32x128xf32>
    %17 = arith.cmpf oge, %4, %16 : vector<32x128xf32>
    %cst_7 = arith.constant 1.000000e+00 : f32
    %18 = vector.broadcast %cst_7 : f32 to vector<32x128xf32>
    %19 = arith.subf %18, %15 : vector<32x128xf32>
    %20 = arith.select %17, %15, %19 : vector<32x128xi1>, vector<32x128xf32>
    %21 = arith.mulf %3, %20 : vector<32x128xf32>
    %22 = arith.subf %3, %21 : vector<32x128xf32>
    %23 = tpu.concatenate %21, %22 in 1 : vector<32x128xf32>, vector<32x128xf32> -> vector<32x256xf32>
    %c0_8 = arith.constant 0 : index
    %c0_9 = arith.constant 0 : index
    %24 = vector.load %arg3[%c0_8, %c0_9] : memref<16x32xf32, #tpu.memory_space<vmem>>, vector<16x32xf32>
    %cst_10 = arith.constant dense<0.000000e+00> : vector<16x256xf32>
    %25 = tpu.matmul %24, %23, %cst_10 {dimension_numbers = #tpu.dot_dimension_numbers<[1], [0], [0], [1], [0, 0, 1, 1], [], []>} : vector<16x32xf32>, vector<32x256xf32>, vector<16x256xf32> -> vector<16x256xf32>
    %26 = vector.extract_strided_slice %25 {offsets = [0, 0], sizes = [16, 128], strides = [1, 1]} : vector<16x256xf32> to vector<16x128xf32>
    %c0_11 = arith.constant 0 : index
    %c0_12 = arith.constant 0 : index
    %27 = vector.load %arg4[%c0_11, %c0_12] : memref<32x128xf32, #tpu.memory_space<vmem>>, vector<16x128xf32>
    tpu.vector_store %arg4[%c0_11, %c0_12], %26 {strides = array<i32>} : memref<32x128xf32, #tpu.memory_space<vmem>>, vector<16x128xf32>,
    %28 = vector.extract_strided_slice %25 {offsets = [0, 128], sizes = [16, 128], strides = [1, 1]} : vector<16x256xf32> to vector<16x128xf32>
    %c16 = arith.constant 16 : index
    %c0_13 = arith.constant 0 : index
    %29 = vector.load %arg4[%c16, %c0_13] : memref<32x128xf32, #tpu.memory_space<vmem>>, vector<16x128xf32>
    tpu.vector_store %arg4[%c16, %c0_13], %28 {strides = array<i32>} : memref<32x128xf32, #tpu.memory_space<vmem>>, vector<16x128xf32>,
    return
  }
  func.func @transform_0(%arg0: i32) -> (i32, i32) {
    %c0_i32 = arith.constant 0 : i32
    %c0_i32_0 = arith.constant 0 : i32
    return %c0_i32, %arg0 : i32, i32
  }
  func.func @transform_1(%arg0: i32) -> (i32, i32) {
    %c0_i32 = arith.constant 0 : i32
    %c0_i32_0 = arith.constant 0 : i32
    %c0_i32_1 = arith.constant 0 : i32
    return %c0_i32, %c0_i32_0 : i32, i32
  }
  func.func @transform_2(%arg0: i32) -> (i32, i32) {
    %c0_i32 = arith.constant 0 : i32
    %c0_i32_0 = arith.constant 0 : i32
    %c0_i32_1 = arith.constant 0 : i32
    return %c0_i32, %c0_i32_0 : i32, i32
  }
  func.func @transform_3(%arg0: i32) -> (i32, i32) {
    %c0_i32 = arith.constant 0 : i32
    %c0_i32_0 = arith.constant 0 : i32
    return %c0_i32, %arg0 : i32, i32
  }
}

</mosaic_0001>

<bundles_post_ra>
// kernel: baseline_separator.1
= control target key start
LH: loop header
LB: loop body
LE: loop exit
PB: predicated region body
PF: predicated region fallthrough
CT: control target
= control target key end

     0   :  { %vm25_vm0 = vcmask 195584   ;;  %vm149_vm5 = vcmask 261120   ;;  %s330_s0 = inlined_call_operand.vmem [shape: f32[24,128], index: 0, kind: input, shape index: {}]   ;;  %s331_s1 = inlined_call_operand.vmem [shape: f32[64,24], index: 1, kind: input, shape index: {}]   ;;  %s332_s2 = inlined_call_operand.vmem [shape: f32[16,32], index: 2, kind: input, shape index: {}]   ;;  %s333_s3 = inlined_call_operand.vmem [shape: f32[32,128], index: 3, kind: output, shape index: {}]  }
   0x1   :  { %v16_v0 = vld [vmem:[%s330_s0 + $0x10] sm:$0xff]  ;;  %v15_v1 = vld [vmem:[%s330_s0 + $0x8] sm:$0xff]  ;;  %v14_v2 = vld [vmem:[%s330_s0] sm:$0xff] }
   0x2   :  { %223 = vmatpush.msra.mxu2 %v16_v0  ;;  %224 = vmatpush.msra.mxu3 %v16_v0  ;;  %v21_v3 = vld [vmem:[%s331_s1 + $0x20] sm:$0xff]  ;;  %v22_v4 = vld [vmem:[%s331_s1 + $0x28] sm:$0xff]  ;;  %v20_v6 = vld [vmem:[%s331_s1 + $0x18] sm:$0xff] }
   0x3   :  { %63 = vmatpush.msra.mxu0 %v16_v0  ;;  %222 = vmatpush.msra.mxu1 %v16_v0  ;;  %v17_v5 = vld [vmem:[%s331_s1] sm:$0xff]  ;;  %v23_v7 = vld [vmem:[%s331_s1 + $0x30] sm:$0xff]  ;;  %v18_v8 = vld [vmem:[%s331_s1 + $0x8] sm:$0xff] }
   0x4   :  { %226 = vmatpush.msra.mxu2 %v15_v1  ;;  %227 = vmatpush.msra.mxu3 %v15_v1  ;;  %v24_v9 = vld [vmem:[%s331_s1 + $0x38] sm:$0xff]  ;;  %v19_v10 = vld [vmem:[%s331_s1 + $0x10] sm:$0xff] }
   0x5   :  { %64 = vmatpush.msra.mxu0 %v15_v1  ;;  %225 = vmatpush.msra.mxu1 %v15_v1 }
   0x6   :  { %229 = vmatpush.msra.mxu2 %v14_v2  ;;  %230 = vmatpush.msra.mxu3 %v14_v2 }
   0x7   :  { %214 = vmatmul.msk.f32.vlgmr.msra.gmra.mxu2 %vm25_vm0, %v21_v3  ;;  %215 = vmatmul.msk.f32.vlgmr.msra.gmra.mxu3 %vm25_vm0, %v22_v4 }
   0x8   :  { %65 = vmatpush.msra.mxu0 %v14_v2  ;;  %228 = vmatpush.msra.mxu1 %v14_v2 }
   0x9   :  { %210 = vmatmul.msk.f32.vlgmr.msra.gmra.mxu0 %vm25_vm0, %v17_v5  ;;  %213 = vmatmul.msk.f32.vlgmr.msra.gmra.mxu1 %vm25_vm0, %v20_v6 }
   0xf   :  { %216 = vmatmul.msk.f32.gmra.mxu3 %vm25_vm0, %v23_v7  ;;  %v147_v7 = vld [vmem:[%s332_s2] sm:$0xff] }
  0x11   :  { %211 = vmatmul.msk.f32.gmra.mxu0 %vm25_vm0, %v18_v8  ;;  %v148_v8 = vld [vmem:[%s332_s2 + $0x8] sm:$0xff] }
  0x17   :  { %217 = vmatmul.msk.f32.gmra.mxu3 %vm25_vm0, %v24_v9 }
  0x19   :  { %212 = vmatmul.msk.f32.gmra.mxu0 %vm25_vm0, %v19_v10 }
  0x86   :  { %v67_v33 = vpop.f32.mrf.mxu0  ;;  %v76_v57 = vpop.f32.mrf.mxu1 }
  0x8a   :  { %v308_v11 = vpop.f32.mrf.mxu2  ;;  %v82_v12 = vpop.f32.mrf.mxu3 }
  0x8b   :  { %v91_v13 = vand.u32 2147483647, %v308_v11  ;;  %v92_v14 = vand.u32 2147483647, %v82_v12  ;;  %vm128_vm2 = vcmp.ge.f32.partialorder %v82_v12, 0.0  ;;  %vm127_vm4 = vcmp.ge.f32.partialorder %v308_v11, 0.0 }
  0x8d   :  { %v95_v15 = vsub.f32 0.0, %v91_v13  ;;  %v96_v16 = vsub.f32 0.0, %v92_v14 }
  0x8e   :  { %v70_v44 = vpop.f32.mrf.mxu0 }
  0x8f   :  { %v99_v17 = vmul.f32 1.442695, %v95_v15  ;;  %v101_v18 = vmul.f32 1.442695, %v96_v16 }
  0x91   :  { %231 = vpow2.f32 %v99_v17 }
  0x92   :  { %v85_v19 = vpop.f32.mrf.mxu3  ;;  %233 = vpow2.f32 %v101_v18 }
  0x93   :  { %v93_v20 = vand.u32 2147483647, %v85_v19  ;;  %vm129_vm1 = vcmp.ge.f32.partialorder %v85_v19, 0.0 }
  0x95   :  { %v97_v21 = vsub.f32 0.0, %v93_v20 }
  0x96   :  { %v73_v55 = vpop.f32.mrf.mxu0 }
  0x97   :  { %v103_v22 = vmul.f32 1.442695, %v97_v21  ;;  %v232_v23 = vpop.eup %231 }
  0x98   :  { %v234_v24 = vpop.eup %233  ;;  %v107_v26 = vadd.f32 1.0, %v232_v23 }
  0x99   :  { %235 = vpow2.f32 %v103_v22  ;;  %v108_v28 = vadd.f32 1.0, %v234_v24 }
  0x9a   :  { %v88_v25 = vpop.f32.mrf.mxu3  ;;  %237 = vrcp.f32 %v107_v26 }
  0x9b   :  { %v94_v27 = vand.u32 2147483647, %v88_v25  ;;  %239 = vrcp.f32 %v108_v28  ;;  %vm130_vm3 = vcmp.ge.f32.partialorder %v88_v25, 0.0 }
  0x9d   :  { %v98_v29 = vsub.f32 0.0, %v94_v27 }
  0x9f   :  { %v236_v30 = vpop.eup %235  ;;  %v105_v31 = vmul.f32 1.442695, %v98_v29 }
  0xa0   :  { %v109_v32 = vadd.f32 1.0, %v236_v30  ;;  %v238_v34 = vpop.eup %237 }
  0xa1   :  { %241 = vpow2.f32 %v105_v31  ;;  %v240_v35 = vpop.eup %239  ;;  %v115_v41 = vmul.f32 %v238_v34, %v107_v26 }
  0xa2   :  { %243 = vrcp.f32 %v109_v32  ;;  %v116_v39 = vmul.f32 %v240_v35, %v108_v28 }
  0xa3   :  { %v119_v45 = vsub.f32 2.0, %v115_v41 }
  0xa4   :  { %v120_v43 = vsub.f32 2.0, %v116_v39 }
  0xa5   :  { %v123_v52 = vmul.f32 %v238_v34, %v119_v45 }
  0xa6   :  { %v124_v49 = vmul.f32 %v240_v35, %v120_v43 }
  0xa7   :  { %v242_v36 = vpop.eup %241  ;;  %v131_v59 = vsub.f32 1.0, %v123_v52 }
  0xa8   :  { %v244_v37 = vpop.eup %243  ;;  %v110_v38 = vadd.f32 1.0, %v242_v36  ;;  %v132_v54 = vsub.f32 1.0, %v124_v49 }
  0xa9   :  { %v117_v40 = vmul.f32 %v244_v37, %v109_v32  ;;  %v135_v0 = vsel %vm127_vm4, %v123_v52, %v131_v59 }
  0xaa   :  { %245 = vrcp.f32 %v110_v38  ;;  %v136_v61 = vsel %vm128_vm2, %v124_v49, %v132_v54  ;;  %v139_v4 = vmul.f32 %v135_v0, %v67_v33 }
  0xab   :  { %v121_v42 = vsub.f32 2.0, %v117_v40  ;;  %v140_v2 = vmul.f32 %v136_v61, %v70_v44 }
  0xac   :  { %v143_v6 = vsub.f32 %v67_v33, %v139_v4 }
  0xad   :  { %v125_v46 = vmul.f32 %v244_v37, %v121_v42  ;;  %v144_v5 = vsub.f32 %v70_v44, %v140_v2 }
  0xaf   :  { %v133_v51 = vsub.f32 1.0, %v125_v46 }
  0xb0   :  { %v246_v47 = vpop.eup %245 }
  0xb1   :  { %v118_v48 = vmul.f32 %v246_v47, %v110_v38  ;;  %v137_v56 = vsel %vm129_vm1, %v125_v46, %v133_v51 }
  0xb2   :  { %v141_v62 = vmul.f32 %v137_v56, %v73_v55 }
  0xb3   :  { %v122_v50 = vsub.f32 2.0, %v118_v48 }
  0xb4   :  { %v145_v3 = vsub.f32 %v73_v55, %v141_v62 }
  0xb5   :  { %v126_v53 = vmul.f32 %v246_v47, %v122_v50 }
  0xb7   :  { %v134_v58 = vsub.f32 1.0, %v126_v53 }
  0xb9   :  { %v138_v60 = vsel %vm130_vm3, %v126_v53, %v134_v58 }
  0xba   :  { %v142_v63 = vmul.f32 %v138_v60, %v76_v57 }
  0xbc   :  { %168 = vmatpush.msrb.mxu1 %v142_v63  ;;  %v146_v1 = vsub.f32 %v76_v57, %v142_v63 }
  0xbe   :  { %169 = vmatpush.msrb.mxu1 %v141_v62  ;;  %191 = vmatpush.msrb.mxu2 %v146_v1 }
  0xc0   :  { %170 = vmatpush.msrb.mxu1 %v140_v2  ;;  %192 = vmatpush.msrb.mxu2 %v145_v3 }
  0xc2   :  { %171 = vmatpush.msrb.mxu1 %v139_v4  ;;  %193 = vmatpush.msrb.mxu2 %v144_v5 }
  0xc3   :  { %218 = vmatmul.msk.f32.vlgmr.msrb.gmra.mxu1 %vm149_vm5, %v147_v7 }
  0xc4   :  { %194 = vmatpush.msrb.mxu2 %v143_v6 }
  0xc5   :  { %220 = vmatmul.msk.f32.vlgmr.msrb.gmra.mxu2 %vm149_vm5, %v147_v7 }
  0xcb   :  { %219 = vmatmul.msk.f32.gmra.mxu1 %vm149_vm5, %v148_v8 }
  0xcd   :  { %221 = vmatmul.msk.f32.gmra.mxu2 %vm149_vm5, %v148_v8 }
 0x140   :  { %v173_v9 = vpop.f32.mrf.mxu1 }
 0x141   :  { %202 = vst [vmem:[%s333_s3] sm:$0xff] %v173_v9 }
 0x148   :  { %v196_v10 = vpop.f32.mrf.mxu2  ;;  %v176_v11 = vpop.f32.mrf.mxu1 }
 0x149   :  { %204 = vst [vmem:[%s333_s3 + $0x10] sm:$0xff] %v196_v10 }
 0x14a   :  { %203 = vst [vmem:[%s333_s3 + $0x8] sm:$0xff] %v176_v11 }
 0x150   :  { %v199_v12 = vpop.f32.mrf.mxu2 }
 0x151   :  { %205 = vst [vmem:[%s333_s3 + $0x18] sm:$0xff] %v199_v12 }

</bundles_post_ra>
